<compile_context>
chip_gen: v7x
topology: tpu7x:2x2x1
jax: 0.10.0
libtpu: 0.0.40
codegen_flags: <defaults>
</compile_context>

<pallas_src>
import functools

import jax
import jax.numpy as jnp
import numpy as np
from jax.experimental import pallas as pl
from jax.experimental.pallas import tpu as pltpu


def _round_up(x, m):
    return ((x + m - 1) // m) * m


# ----------------------------------------------------------------------------
# Fused rel + tail kernel
#   grid = (num_E_tiles, num_tail_class_tiles)
# ----------------------------------------------------------------------------
def _fused_rel_tail_kernel(
    # inputs
    eh_ref,       # (TE, Dc)     bf16  edge-head embeddings tile
    ers_ref,      # (TE, Dr)     bf16  static rel embeddings tile
    erd_ref,      # (TE, Dr)     bf16  dynamic rel embeddings tile
    tlab_ref,     # (TE, 1)      int32 tail labels
    rlab_ref,     # (TE, 1)      int32 rel labels
    w1t_eh_ref,   # (Dc, Ht)     bf16
    w1t_rs_ref,   # (Dr, Ht)     bf16
    w1t_rd_ref,   # (Dr, Ht)     bf16
    b1t_ref,      # (1, Ht)      f32   (= b1_tail + gemb @ W1_tail[G rows])
    w2t_ref,      # (Ht, TC)     bf16  tail W2 class tile
    b2t_ref,      # (1, TC)      f32   (-1e30 on padded classes)
    w1r_eh_ref,   # (Dc, Hr)     bf16
    b1r_ref,      # (1, Hr)      f32   (= b1_rel + gemb @ W1_rel[G rows])
    w2r_ref,      # (Hr, CrP)    bf16
    b2r_ref,      # (1, CrP)     f32   (-1e30 on padded classes)
    # outputs
    tail_logits_ref,   # (TE, TC)      pred dtype
    rel_logits_ref,    # (TE, CrP)     pred dtype
    tail_ce_ref,       # (1, 8, 128)   f32  per-E-tile CE partial sum
    rel_ce_ref,        # (1, 8, 128)   f32  per-E-tile CE partial sum
    # scratch
    h_t,          # (TE, Ht) bf16   tail hidden, reused across class tiles
    m_sc,         # (TE, 1)  f32    running max
    l_sc,         # (TE, 1)  f32    running sum of exp
    p_sc,         # (TE, 1)  f32    picked (label) logit
    *, num_edges, te, tc,
):
    i = pl.program_id(0)
    j = pl.program_id(1)

    row = jax.lax.broadcasted_iota(jnp.int32, (te, 1), 0) + i * te
    valid = (row < num_edges).astype(jnp.float32)            # (TE, 1) row mask

    @pl.when(j == 0)
    def _():
        eh = eh_ref[...]
        # ---- tail hidden: per-segment matmuls + graph-folded bias ----
        acc = jnp.dot(eh, w1t_eh_ref[...], preferred_element_type=jnp.float32)
        acc += jnp.dot(ers_ref[...], w1t_rs_ref[...],
                       preferred_element_type=jnp.float32)
        acc += jnp.dot(erd_ref[...], w1t_rd_ref[...],
                       preferred_element_type=jnp.float32)
        h_t[...] = jnp.tanh(acc + b1t_ref[...]).astype(h_t.dtype)
        # online-softmax state for the tail branch
        m_sc[...] = jnp.full_like(m_sc, -1e30)
        l_sc[...] = jnp.zeros_like(l_sc)
        p_sc[...] = jnp.zeros_like(p_sc)

        # ---- rel branch: full (padded) class dim resident, once per E tile ----
        h_r = jnp.tanh(
            jnp.dot(eh, w1r_eh_ref[...], preferred_element_type=jnp.float32)
            + b1r_ref[...])
        rlog = jnp.dot(h_r.astype(jnp.bfloat16), w2r_ref[...],
                       preferred_element_type=jnp.float32) + b2r_ref[...]
        rel_logits_ref[...] = rlog.astype(rel_logits_ref.dtype)
        rm = jnp.max(rlog, axis=-1, keepdims=True)
        rlse = rm + jnp.log(jnp.sum(jnp.exp(rlog - rm), axis=-1, keepdims=True))
        rcol = jax.lax.broadcasted_iota(jnp.int32, rlog.shape, 1)
        rpicked = jnp.sum(jnp.where(rcol == rlab_ref[...], rlog, 0.0),
                          axis=-1, keepdims=True)
        rce = jnp.sum(valid * (rlse - rpicked))
        rel_ce_ref[...] = jnp.full(rel_ce_ref.shape, rce, dtype=jnp.float32)

    # ---- tail branch: class tile j (f32 accumulate, bf16 operands) ----
    tlog = jnp.dot(h_t[...], w2t_ref[...],
                   preferred_element_type=jnp.float32) + b2t_ref[...]
    tail_logits_ref[...] = tlog.astype(tail_logits_ref.dtype)

    # online softmax + picked-logit accumulation (CE math stays f32)
    m_new = jnp.maximum(m_sc[...], jnp.max(tlog, axis=-1, keepdims=True))
    l_sc[...] = (jnp.exp(m_sc[...] - m_new) * l_sc[...]
                 + jnp.sum(jnp.exp(tlog - m_new), axis=-1, keepdims=True))
    m_sc[...] = m_new
    col = jax.lax.broadcasted_iota(jnp.int32, tlog.shape, 1) + j * tc
    p_sc[...] += jnp.sum(jnp.where(col == tlab_ref[...], tlog, 0.0),
                         axis=-1, keepdims=True)

    @pl.when(j == pl.num_programs(1) - 1)
    def _():
        lse = m_sc[...] + jnp.log(l_sc[...])
        tce = jnp.sum(valid * (lse - p_sc[...]))
        tail_ce_ref[...] = jnp.full(tail_ce_ref.shape, tce, dtype=jnp.float32)


# ----------------------------------------------------------------------------
# Head kernel: one (8-row padded) input row, tiled over classes.
#   grid = (num_head_class_tiles,)
# ----------------------------------------------------------------------------
def _head_kernel(x_ref, w1_ref, b1_ref, w2_ref, b2_ref,
                 logits_ref, lse_ref, h_sc, m_sc, l_sc):
    j = pl.program_id(0)

    @pl.when(j == 0)
    def _():
        h = jnp.tanh(
            jnp.dot(x_ref[...], w1_ref[...],
                    preferred_element_type=jnp.float32) + b1_ref[...])
        h_sc[...] = h.astype(h_sc.dtype)
        m_sc[...] = jnp.full_like(m_sc, -1e30)
        l_sc[...] = jnp.zeros_like(l_sc)

    logits = jnp.dot(h_sc[...], w2_ref[...],
                     preferred_element_type=jnp.float32) + b2_ref[...]
    logits_ref[...] = logits.astype(logits_ref.dtype)
    m_new = jnp.maximum(m_sc[...], jnp.max(logits, axis=-1, keepdims=True))
    l_sc[...] = (jnp.exp(m_sc[...] - m_new) * l_sc[...]
                 + jnp.sum(jnp.exp(logits - m_new), axis=-1, keepdims=True))
    m_sc[...] = m_new

    @pl.when(j == pl.num_programs(0) - 1)
    def _():
        lse = m_sc[...] + jnp.log(l_sc[...])
        lse_ref[...] = jnp.broadcast_to(lse, lse_ref.shape)


# ----------------------------------------------------------------------------
# Parameter init (deterministic, synthetic; mirrors nn.Linear defaults)
# ----------------------------------------------------------------------------
def _linear_params(key, fan_in, fan_out):
    k1, k2 = jax.random.split(key)
    scale = 1.0 / np.sqrt(fan_in)
    w = jax.random.uniform(k1, (fan_in, fan_out), jnp.float32, -scale, scale)
    b = jax.random.uniform(k2, (fan_out,), jnp.float32, -scale, scale)
    return w, b


def init_edge_model_params(key, num_entities, num_rels, rel_embed_dim,
                           combined_emb_dim, graph_emb_dim):
    keys = jax.random.split(key, 8)
    params = {}
    params["rel_embeds"] = jax.random.normal(
        keys[0], (num_rels, rel_embed_dim), jnp.float32)

    g = graph_emb_dim
    params["head_w1"], params["head_b1"] = _linear_params(keys[1], g, 4 * g)
    params["head_w2"], params["head_b2"] = _linear_params(keys[2], 4 * g, num_entities)

    d_r = combined_emb_dim + graph_emb_dim
    params["rel_w1"], params["rel_b1"] = _linear_params(keys[3], d_r, d_r)
    params["rel_w2"], params["rel_b2"] = _linear_params(keys[4], d_r, num_rels)

    d_t = combined_emb_dim + graph_emb_dim + 2 * rel_embed_dim
    params["tail_w1"], params["tail_b1"] = _linear_params(keys[5], d_t, 2 * d_t)
    params["tail_w2"], params["tail_b2"] = _linear_params(keys[6], 2 * d_t, num_entities)
    return params


# ----------------------------------------------------------------------------
# EdgeModel forward
# ----------------------------------------------------------------------------
def edge_model_forward(params, combined_emb, static_emb, dynamic_emb,
                       dynamic_relation_emb, edge_head, edge_tail, edge_rel,
                       pred_dtype=jnp.bfloat16):
    """EdgeModel.forward with combiner mode='concat', graph_readout_op='max',
    readout_node_type='static', dropout=0.0, G.ndata[NID]==arange, 1 graph."""
    f32, bf16 = jnp.float32, jnp.bfloat16

    E = int(edge_head.shape[0])
    if E == 0:
        raise ValueError("num_edges == 0: cross-entropy mean is undefined")
    C = params["tail_w2"].shape[1]          # num_entities
    R = params["rel_w2"].shape[1]           # num_rels
    Dc = combined_emb.shape[1]
    G = static_emb.shape[1]
    Dr = params["rel_embeds"].shape[1]
    Ht = params["tail_w1"].shape[1]
    Hr = params["rel_w1"].shape[1]
    Hh = params["head_w1"].shape[1]

    # graph readout 'max' over static node embeddings: tiny reduce, leave to XLA
    graph_emb = jnp.max(static_emb.astype(f32), axis=0, keepdims=True)   # (1, G)
    g_bf = graph_emb.astype(bf16)

    # gathers, cast to bf16 to halve gather + kernel-input HBM traffic
    # TODO(synk): an in-kernel DMA gather (scalar prefetch + per-row copies)
    # would avoid materializing these [E, Dc]/[E, Dr] copies in HBM.
    dyn_rel_emb = dynamic_relation_emb[:, :, 1]
    eh = jnp.take(combined_emb.astype(bf16), edge_head, axis=0)          # [E, Dc]
    ers = jnp.take(params["rel_embeds"].astype(bf16), edge_rel, axis=0)  # [E, Dr]
    erd = jnp.take(dyn_rel_emb.astype(bf16), edge_rel, axis=0)           # [E, Dr]

    # ---- tiling (sized to fit the 32 MiB scoped-VMEM default on all gens,
    #       incl. v7x with 64 MiB physical) ----
    te = min(256, _round_up(E, 8))
    e_pad = _round_up(E, te)
    tc = min(512, _round_up(C, 128))
    c_pad = _round_up(C, tc)
    cr_pad = _round_up(R, 128)
    n_e, n_c = e_pad // te, c_pad // tc

    def pad_rows(a):
        return jnp.pad(a, ((0, e_pad - E), (0, 0)))

    eh_p, ers_p, erd_p = pad_rows(eh), pad_rows(ers), pad_rows(erd)
    tlab = jnp.pad(edge_tail.astype(jnp.int32), (0, e_pad - E)).reshape(e_pad, 1)
    rlab = jnp.pad(edge_rel.astype(jnp.int32), (0, e_pad - E)).reshape(e_pad, 1)

    # ---- split W1 by input segment; fold the graph segment into the bias ----
    w1t = params["tail_w1"]
    w1t_eh = w1t[:Dc].astype(bf16)
    w1t_rs = w1t[Dc + G:Dc + G + Dr].astype(bf16)
    w1t_rd = w1t[Dc + G + Dr:].astype(bf16)
    b1t = (params["tail_b1"][None, :]
           + jnp.dot(g_bf, w1t[Dc:Dc + G].astype(bf16),
                     preferred_element_type=f32))
    w1r = params["rel_w1"]
    w1r_eh = w1r[:Dc].astype(bf16)
    b1r = (params["rel_b1"][None, :]
           + jnp.dot(g_bf, w1r[Dc:Dc + G].astype(bf16),
                     preferred_element_type=f32))

    # class-dim padding: zero weight cols + -1e30 bias -> padded logits inert
    def pad_classes(w2, b2, cp):
        c = w2.shape[1]
        return (jnp.pad(w2, ((0, 0), (0, cp - c))).astype(bf16),
                jnp.pad(b2, (0, cp - c), constant_values=-1e30)
                .reshape(1, cp).astype(f32))

    w2t, b2t = pad_classes(params["tail_w2"], params["tail_b2"], c_pad)
    w2r, b2r = pad_classes(params["rel_w2"], params["rel_b2"], cr_pad)

    # ---- fused rel + tail kernel ----
    kernel = functools.partial(_fused_rel_tail_kernel,
                               num_edges=E, te=te, tc=tc)

    pred_bytes = jnp.dtype(pred_dtype).itemsize
    est_flops = 2 * E * ((Dc + 2 * Dr) * Ht + Ht * c_pad + Dc * Hr + Hr * cr_pad)
    est_trans = E * (Ht + Hr + c_pad + cr_pad)
    est_bytes = (2 * (eh_p.size + ers_p.size + erd_p.size
                      + w1t_eh.size + w1t_rs.size + w1t_rd.size
                      + w1r_eh.size + w2t.size + w2r.size)
                 + e_pad * (c_pad + cr_pad) * pred_bytes)
    # rough live VMEM (streamed blocks double-buffered) + headroom, capped
    blk_bytes = (2 * (te * tc * 4 + Ht * tc * 2 + te * (Dc + 2 * Dr) * 2)
                 + te * cr_pad * 4 + Hr * cr_pad * 2 + te * Ht * 2
                 + 2 * (w1t_eh.size + w1t_rs.size + w1t_rd.size + w1r_eh.size))
    vmem_limit = int(min(max(2 * blk_bytes, 16 * 2**20), 32 * 2**20))

    tail_logits_p, rel_logits_p, tail_ce, rel_ce = pl.pallas_call(
        kernel,
        grid=(n_e, n_c),
        in_specs=[
            pl.BlockSpec((te, Dc), lambda i, j: (i, 0)),
            pl.BlockSpec((te, Dr), lambda i, j: (i, 0)),
            pl.BlockSpec((te, Dr), lambda i, j: (i, 0)),
            pl.BlockSpec((te, 1), lambda i, j: (i, 0)),
            pl.BlockSpec((te, 1), lambda i, j: (i, 0)),
            pl.BlockSpec((Dc, Ht), lambda i, j: (0, 0)),
            pl.BlockSpec((Dr, Ht), lambda i, j: (0, 0)),
            pl.BlockSpec((Dr, Ht), lambda i, j: (0, 0)),
            pl.BlockSpec((1, Ht), lambda i, j: (0, 0)),
            pl.BlockSpec((Ht, tc), lambda i, j: (0, j)),
            pl.BlockSpec((1, tc), lambda i, j: (0, j)),
            pl.BlockSpec((Dc, Hr), lambda i, j: (0, 0)),
            pl.BlockSpec((1, Hr), lambda i, j: (0, 0)),
            pl.BlockSpec((Hr, cr_pad), lambda i, j: (0, 0)),
            pl.BlockSpec((1, cr_pad), lambda i, j: (0, 0)),
        ],
        out_specs=(
            pl.BlockSpec((te, tc), lambda i, j: (i, j)),
            pl.BlockSpec((te, cr_pad), lambda i, j: (i, 0)),
            pl.BlockSpec((1, 8, 128), lambda i, j: (i, 0, 0)),
            pl.BlockSpec((1, 8, 128), lambda i, j: (i, 0, 0)),
        ),
        out_shape=(
            jax.ShapeDtypeStruct((e_pad, c_pad), pred_dtype),
            jax.ShapeDtypeStruct((e_pad, cr_pad), pred_dtype),
            jax.ShapeDtypeStruct((n_e, 8, 128), jnp.float32),
            jax.ShapeDtypeStruct((n_e, 8, 128), jnp.float32),
        ),
        scratch_shapes=[
            pltpu.VMEM((te, Ht), jnp.bfloat16),
            pltpu.VMEM((te, 1), jnp.float32),
            pltpu.VMEM((te, 1), jnp.float32),
            pltpu.VMEM((te, 1), jnp.float32),
        ],
        compiler_params=pltpu.CompilerParams(
            dimension_semantics=("parallel", "arbitrary"),
            vmem_limit_bytes=vmem_limit),
        cost_estimate=pl.CostEstimate(
            flops=int(est_flops), transcendentals=int(est_trans),
            bytes_accessed=int(est_bytes)),
    )(eh_p, ers_p, erd_p, tlab, rlab,
      w1t_eh, w1t_rs, w1t_rd, b1t, w2t, b2t,
      w1r_eh, b1r, w2r, b2r)

    log_prob_tail = -(jnp.sum(tail_ce[:, 0, 0]) / E)
    log_prob_rel = -(jnp.sum(rel_ce[:, 0, 0]) / E)
    tail_pred = tail_logits_p[:E, :C]
    rel_pred = rel_logits_p[:E, :R]

    # ---- head branch: identical logits row for every edge -> compute once ----
    tch = min(512, _round_up(C, 128))
    ch_pad = _round_up(C, tch)
    w2h, b2h = pad_classes(params["head_w2"], params["head_b2"], ch_pad)
    x8 = jnp.zeros((8, G), bf16).at[0].set(graph_emb[0].astype(bf16))

    head_logits8, head_lse8 = pl.pallas_call(
        _head_kernel,
        grid=(ch_pad // tch,),
        in_specs=[
            pl.BlockSpec((8, G), lambda j: (0, 0)),
            pl.BlockSpec((G, Hh), lambda j: (0, 0)),
            pl.BlockSpec((1, Hh), lambda j: (0, 0)),
            pl.BlockSpec((Hh, tch), lambda j: (0, j)),
            pl.BlockSpec((1, tch), lambda j: (0, j)),
        ],
        out_specs=(
            pl.BlockSpec((8, tch), lambda j: (0, j)),
            pl.BlockSpec((8, 128), lambda j: (0, 0)),
        ),
        out_shape=(
            jax.ShapeDtypeStruct((8, ch_pad), jnp.float32),   # tiny -> keep f32
            jax.ShapeDtypeStruct((8, 128), jnp.float32),
        ),
        scratch_shapes=[
            pltpu.VMEM((8, Hh), jnp.bfloat16),
            pltpu.VMEM((8, 1), jnp.float32),
            pltpu.VMEM((8, 1), jnp.float32),
        ],
        compiler_params=pltpu.CompilerParams(
            dimension_semantics=("arbitrary",)),
    )(x8, params["head_w1"].astype(bf16),
      params["head_b1"].reshape(1, Hh).astype(f32), w2h, b2h)

    head_row = head_logits8[0, :C]                       # (C,) f32
    lse_h = head_lse8[0, 0]
    picked_h = jnp.take(head_row, edge_head)             # labels = NID[edge_head] = edge_head
    log_prob_head = -(lse_h - jnp.mean(picked_h))
    head_pred = jnp.broadcast_to(head_row[None, :], (E, C)).astype(pred_dtype)

    log_prob = log_prob_tail + 0.2 * log_prob_rel + 0.1 * log_prob_head
    return log_prob, head_pred, rel_pred, tail_pred


# ----------------------------------------------------------------------------
# Pure-JAX reference (mirrors bf16-MXU / f32-accumulate numerics)
# ----------------------------------------------------------------------------
def _ref_mlp_ce(x, w1, b1, w2, b2, labels):
    bf16, f32 = jnp.bfloat16, jnp.float32
    h = jnp.tanh(jnp.dot(x.astype(bf16), w1.astype(bf16),
                         preferred_element_type=f32) + b1)
    logits = jnp.dot(h.astype(bf16), w2.astype(bf16),
                     preferred_element_type=f32) + b2
    logp = jax.nn.log_softmax(logits, axis=-1)
    ce = -jnp.mean(logp[jnp.arange(x.shape[0]), labels])
    return -ce, logits


def _ref_forward(params, combined_emb, static_emb, dynamic_relation_emb,
                 edge_head, edge_tail, edge_rel):
    e = edge_head.shape[0]
    eh = combined_emb[edge_head]
    dyn_rel = dynamic_relation_emb[:, :, 1]
    gemb = jnp.max(static_emb, axis=0, keepdims=True)
    grep = jnp.broadcast_to(gemb, (e, gemb.shape[1]))
    emb_t = jnp.concatenate(
        [eh, grep, params["rel_embeds"][edge_rel], dyn_rel[edge_rel]], axis=1)
    lt, tp = _ref_mlp_ce(emb_t, params["tail_w1"], params["tail_b1"],
                         params["tail_w2"], params["tail_b2"], edge_tail)
    lr, rp = _ref_mlp_ce(jnp.concatenate([eh, grep], axis=1),
                         params["rel_w1"], params["rel_b1"],
                         params["rel_w2"], params["rel_b2"], edge_rel)
    lh, hp = _ref_mlp_ce(grep, params["head_w1"], params["head_b1"],
                         params["head_w2"], params["head_b2"], edge_head)
    return lt + 0.2 * lr + 0.1 * lh, hp, rp, tp


# ----------------------------------------------------------------------------
if __name__ == "__main__":
    # small deterministic config
    num_entities = 16        # == number of graph nodes (NID == arange)
    num_rels = 4
    rel_embed_dim = 8
    static_emb_dim = 16
    dynamic_emb_dim = 16
    combined_emb_dim = static_emb_dim + dynamic_emb_dim   # mode='concat'
    graph_emb_dim = static_emb_dim                        # readout 'max' on 'static'
    num_edges = 8

    key = jax.random.PRNGKey(0)
    kp, k1, k2, k3, k4, k5, k6, k7 = jax.random.split(key, 8)

    params = init_edge_model_params(
        kp, num_entities, num_rels, rel_embed_dim, combined_emb_dim, graph_emb_dim)

    combined_emb = jax.random.normal(k1, (num_entities, combined_emb_dim), jnp.float32)
    static_emb = jax.random.normal(k2, (num_entities, static_emb_dim), jnp.float32)
    dynamic_emb = jax.random.normal(k3, (num_entities, dynamic_emb_dim), jnp.float32)
    dynamic_relation_emb = jax.random.normal(
        k4, (num_rels, rel_embed_dim, 3), jnp.float32)
    edge_head = jax.random.randint(k5, (num_edges,), 0, num_entities, jnp.int32)
    edge_tail = jax.random.randint(k6, (num_edges,), 0, num_entities, jnp.int32)
    edge_rel = jax.random.randint(k7, (num_edges,), 0, num_rels, jnp.int32)

    log_prob, head_pred, rel_pred, tail_pred = edge_model_forward(
        params, combined_emb, static_emb, dynamic_emb,
        dynamic_relation_emb, edge_head, edge_tail, edge_rel)
    jax.block_until_ready((log_prob, head_pred, rel_pred, tail_pred))

    # sanity check vs pure-JAX reference (same bf16-matmul numerics)
    ref_lp, ref_hp, ref_rp, ref_tp = _ref_forward(
        params, combined_emb, static_emb, dynamic_relation_emb,
        edge_head, edge_tail, edge_rel)
    np.testing.assert_allclose(np.asarray(log_prob), np.asarray(ref_lp),
                               rtol=5e-3, atol=5e-3)
    np.testing.assert_allclose(np.asarray(tail_pred.astype(jnp.float32)),
                               np.asarray(ref_tp), rtol=5e-2, atol=5e-2)
    np.testing.assert_allclose(np.asarray(rel_pred.astype(jnp.float32)),
                               np.asarray(ref_rp), rtol=5e-2, atol=5e-2)
    np.testing.assert_allclose(np.asarray(head_pred.astype(jnp.float32)),
                               np.asarray(ref_hp), rtol=5e-2, atol=5e-2)

    print("KERNEL_OK")
</pallas_src>

<mosaic_0001>
module attributes {stable_mosaic.version = 11 : i64} {
  func.func @_fused_rel_tail_kernel(%arg0: i32, %arg1: i32, %arg2: memref<8x32xbf16, #tpu.memory_space<vmem>>, %arg3: memref<8x8xbf16, #tpu.memory_space<vmem>>, %arg4: memref<8x8xbf16, #tpu.memory_space<vmem>>, %arg5: memref<8x1xi32, #tpu.memory_space<vmem>>, %arg6: memref<8x1xi32, #tpu.memory_space<vmem>>, %arg7: memref<32x128xbf16, #tpu.memory_space<vmem>>, %arg8: memref<8x128xbf16, #tpu.memory_space<vmem>>, %arg9: memref<8x128xbf16, #tpu.memory_space<vmem>>, %arg10: memref<1x128xf32, #tpu.memory_space<vmem>>, %arg11: memref<128x128xbf16, #tpu.memory_space<vmem>>, %arg12: memref<1x128xf32, #tpu.memory_space<vmem>>, %arg13: memref<32x48xbf16, #tpu.memory_space<vmem>>, %arg14: memref<1x48xf32, #tpu.memory_space<vmem>>, %arg15: memref<48x128xbf16, #tpu.memory_space<vmem>>, %arg16: memref<1x128xf32, #tpu.memory_space<vmem>>, %arg17: memref<8x128xbf16, #tpu.memory_space<vmem>>, %arg18: memref<8x128xbf16, #tpu.memory_space<vmem>>, %arg19: memref<1x8x128xf32, #tpu.memory_space<vmem>>, %arg20: memref<1x8x128xf32, #tpu.memory_space<vmem>>, %arg21: memref<8x128xbf16, #tpu.memory_space<vmem>>, %arg22: memref<8x1xf32, #tpu.memory_space<vmem>>, %arg23: memref<8x1xf32, #tpu.memory_space<vmem>>, %arg24: memref<8x1xf32, #tpu.memory_space<vmem>>) attributes {dimension_semantics = [#tpu.dimension_semantics<parallel>, #tpu.dimension_semantics<arbitrary>], iteration_bounds = array<i64: 1, 1>, scalar_prefetch = 0 : i64, scratch_operands = 4 : i64, tpu.core_type = #tpu.core_type<tc>, window_params = [{transform_indices = @transform_0, window_bounds = array<i64: 8, 32>}, {transform_indices = @transform_1, window_bounds = array<i64: 8, 8>}, {transform_indices = @transform_2, window_bounds = array<i64: 8, 8>}, {transform_indices = @transform_3, window_bounds = array<i64: 8, 1>}, {transform_indices = @transform_4, window_bounds = array<i64: 8, 1>}, {pipeline_mode = #tpu.pipeline_mode<synchronous>, transform_indices = @transform_5, window_bounds = array<i64: 32, 128>}, {pipeline_mode = #tpu.pipeline_mode<synchronous>, transform_indices = @transform_6, window_bounds = array<i64: 8, 128>}, {pipeline_mode = #tpu.pipeline_mode<synchronous>, transform_indices = @transform_7, window_bounds = array<i64: 8, 128>}, {pipeline_mode = #tpu.pipeline_mode<synchronous>, transform_indices = @transform_8, window_bounds = array<i64: 1, 128>}, {transform_indices = @transform_9, window_bounds = array<i64: 128, 128>}, {transform_indices = @transform_10, window_bounds = array<i64: 1, 128>}, {pipeline_mode = #tpu.pipeline_mode<synchronous>, transform_indices = @transform_11, window_bounds = array<i64: 32, 48>}, {pipeline_mode = #tpu.pipeline_mode<synchronous>, transform_indices = @transform_12, window_bounds = array<i64: 1, 48>}, {pipeline_mode = #tpu.pipeline_mode<synchronous>, transform_indices = @transform_13, window_bounds = array<i64: 48, 128>}, {pipeline_mode = #tpu.pipeline_mode<synchronous>, transform_indices = @transform_14, window_bounds = array<i64: 1, 128>}, {transform_indices = @transform_15, window_bounds = array<i64: 8, 128>}, {transform_indices = @transform_16, window_bounds = array<i64: 8, 128>}, {transform_indices = @transform_17, window_bounds = array<i64: 1, 8, 128>}, {transform_indices = @transform_18, window_bounds = array<i64: 1, 8, 128>}]} {
    %0 = tpu.iota {dimensions = array<i32: 0>} : vector<8x1xi32>
    %c8_i32 = arith.constant 8 : i32
    %1 = arith.muli %arg0, %c8_i32 : i32
    %2 = vector.broadcast %1 : i32 to vector<8x1xi32>
    %3 = arith.addi %0, %2 : vector<8x1xi32>
    %c8_i32_0 = arith.constant 8 : i32
    %4 = vector.broadcast %c8_i32_0 : i32 to vector<8x1xi32>
    %5 = arith.cmpi slt, %3, %4 : vector<8x1xi32>
    %6 = arith.extui %5 : vector<8x1xi1> to vector<8x1xi32>
    %7 = arith.sitofp %6 : vector<8x1xi32> to vector<8x1xf32>
    %c0_i32 = arith.constant 0 : i32
    %8 = arith.cmpi eq, %arg1, %c0_i32 : i32
    %9 = arith.extui %8 : i1 to i32
    %c0_i32_1 = arith.constant 0 : i32
    %10 = arith.cmpi ne, %9, %c0_i32_1 : i32
    scf.if %10 {
      %c0_31 = arith.constant 0 : index
      %c0_32 = arith.constant 0 : index
      %53 = vector.load %arg2[%c0_31, %c0_32] : memref<8x32xbf16, #tpu.memory_space<vmem>>, vector<8x32xbf16>
      %c0_33 = arith.constant 0 : index
      %c0_34 = arith.constant 0 : index
      %54 = vector.load %arg7[%c0_33, %c0_34] : memref<32x128xbf16, #tpu.memory_space<vmem>>, vector<32x128xbf16>
      %cst_35 = arith.constant dense<0.000000e+00> : vector<8x128xf32>
      %55 = tpu.matmul %53, %54, %cst_35 {dimension_numbers = #tpu.dot_dimension_numbers<[1], [0], [0], [1], [0, 0, 1, 1], [], []>} : vector<8x32xbf16>, vector<32x128xbf16>, vector<8x128xf32> -> vector<8x128xf32>
      %c0_36 = arith.constant 0 : index
      %c0_37 = arith.constant 0 : index
      %56 = vector.load %arg3[%c0_36, %c0_37] : memref<8x8xbf16, #tpu.memory_space<vmem>>, vector<8x8xbf16>
      %c0_38 = arith.constant 0 : index
      %c0_39 = arith.constant 0 : index
      %57 = vector.load %arg8[%c0_38, %c0_39] : memref<8x128xbf16, #tpu.memory_space<vmem>>, vector<8x128xbf16>
      %cst_40 = arith.constant dense<0.000000e+00> : vector<8x128xf32>
      %58 = tpu.matmul %56, %57, %cst_40 {dimension_numbers = #tpu.dot_dimension_numbers<[1], [0], [0], [1], [0, 0, 1, 1], [], []>} : vector<8x8xbf16>, vector<8x128xbf16>, vector<8x128xf32> -> vector<8x128xf32>
      %59 = arith.addf %55, %58 : vector<8x128xf32>
      %c0_41 = arith.constant 0 : index
      %c0_42 = arith.constant 0 : index
      %60 = vector.load %arg4[%c0_41, %c0_42] : memref<8x8xbf16, #tpu.memory_space<vmem>>, vector<8x8xbf16>
      %c0_43 = arith.constant 0 : index
      %c0_44 = arith.constant 0 : index
      %61 = vector.load %arg9[%c0_43, %c0_44] : memref<8x128xbf16, #tpu.memory_space<vmem>>, vector<8x128xbf16>
      %cst_45 = arith.constant dense<0.000000e+00> : vector<8x128xf32>
      %62 = tpu.matmul %60, %61, %cst_45 {dimension_numbers = #tpu.dot_dimension_numbers<[1], [0], [0], [1], [0, 0, 1, 1], [], []>} : vector<8x8xbf16>, vector<8x128xbf16>, vector<8x128xf32> -> vector<8x128xf32>
      %63 = arith.addf %59, %62 : vector<8x128xf32>
      %c0_46 = arith.constant 0 : index
      %c0_47 = arith.constant 0 : index
      %64 = vector.load %arg10[%c0_46, %c0_47] : memref<1x128xf32, #tpu.memory_space<vmem>>, vector<1x128xf32>
      %65 = vector.broadcast %64 : vector<1x128xf32> to vector<8x128xf32>
      %66 = arith.addf %63, %65 : vector<8x128xf32>
      %67 = math.tanh %66 : vector<8x128xf32>
      %68 = arith.truncf %67 : vector<8x128xf32> to vector<8x128xbf16>
      %c0_48 = arith.constant 0 : index
      %c0_49 = arith.constant 0 : index
      %69 = vector.load %arg21[%c0_48, %c0_49] : memref<8x128xbf16, #tpu.memory_space<vmem>>, vector<8x128xbf16>
      tpu.vector_store %arg21[%c0_48, %c0_49], %68 {strides = array<i32>} : memref<8x128xbf16, #tpu.memory_space<vmem>>, vector<8x128xbf16>,
      %cst_50 = arith.constant -1.000000e+30 : f32
      %70 = vector.broadcast %cst_50 : f32 to vector<8x1xf32>
      %c0_51 = arith.constant 0 : index
      %c0_52 = arith.constant 0 : index
      %71 = vector.load %arg22[%c0_51, %c0_52] : memref<8x1xf32, #tpu.memory_space<vmem>>, vector<8x1xf32>
      tpu.vector_store %arg22[%c0_51, %c0_52], %70 {strides = array<i32>} : memref<8x1xf32, #tpu.memory_space<vmem>>, vector<8x1xf32>,
      %cst_53 = arith.constant 0.000000e+00 : f32
      %72 = vector.broadcast %cst_53 : f32 to vector<8x1xf32>
      %c0_54 = arith.constant 0 : index
      %c0_55 = arith.constant 0 : index
      %73 = vector.load %arg23[%c0_54, %c0_55] : memref<8x1xf32, #tpu.memory_space<vmem>>, vector<8x1xf32>
      tpu.vector_store %arg23[%c0_54, %c0_55], %72 {strides = array<i32>} : memref<8x1xf32, #tpu.memory_space<vmem>>, vector<8x1xf32>,
      %cst_56 = arith.constant 0.000000e+00 : f32
      %74 = vector.broadcast %cst_56 : f32 to vector<8x1xf32>
      %c0_57 = arith.constant 0 : index
      %c0_58 = arith.constant 0 : index
      %75 = vector.load %arg24[%c0_57, %c0_58] : memref<8x1xf32, #tpu.memory_space<vmem>>, vector<8x1xf32>
      tpu.vector_store %arg24[%c0_57, %c0_58], %74 {strides = array<i32>} : memref<8x1xf32, #tpu.memory_space<vmem>>, vector<8x1xf32>,
      %c0_59 = arith.constant 0 : index
      %c0_60 = arith.constant 0 : index
      %76 = vector.load %arg13[%c0_59, %c0_60] : memref<32x48xbf16, #tpu.memory_space<vmem>>, vector<32x48xbf16>
      %cst_61 = arith.constant dense<0.000000e+00> : vector<8x48xf32>
      %77 = tpu.matmul %53, %76, %cst_61 {dimension_numbers = #tpu.dot_dimension_numbers<[1], [0], [0], [1], [0, 0, 1, 1], [], []>} : vector<8x32xbf16>, vector<32x48xbf16>, vector<8x48xf32> -> vector<8x48xf32>
      %c0_62 = arith.constant 0 : index
      %c0_63 = arith.constant 0 : index
      %78 = vector.load %arg14[%c0_62, %c0_63] : memref<1x48xf32, #tpu.memory_space<vmem>>, vector<1x48xf32>
      %79 = vector.broadcast %78 : vector<1x48xf32> to vector<8x48xf32>
      %80 = arith.addf %77, %79 : vector<8x48xf32>
      %81 = math.tanh %80 : vector<8x48xf32>
      %82 = arith.truncf %81 : vector<8x48xf32> to vector<8x48xbf16>
      %c0_64 = arith.constant 0 : index
      %c0_65 = arith.constant 0 : index
      %83 = vector.load %arg15[%c0_64, %c0_65] : memref<48x128xbf16, #tpu.memory_space<vmem>>, vector<48x128xbf16>
      %cst_66 = arith.constant dense<0.000000e+00> : vector<8x128xf32>
      %84 = tpu.matmul %82, %83, %cst_66 {dimension_numbers = #tpu.dot_dimension_numbers<[1], [0], [0], [1], [0, 0, 1, 1], [], []>} : vector<8x48xbf16>, vector<48x128xbf16>, vector<8x128xf32> -> vector<8x128xf32>
      %c0_67 = arith.constant 0 : index
      %c0_68 = arith.constant 0 : index
      %85 = vector.load %arg16[%c0_67, %c0_68] : memref<1x128xf32, #tpu.memory_space<vmem>>, vector<1x128xf32>
      %86 = vector.broadcast %85 : vector<1x128xf32> to vector<8x128xf32>
      %87 = arith.addf %84, %86 : vector<8x128xf32>
      %88 = arith.truncf %87 : vector<8x128xf32> to vector<8x128xbf16>
      %c0_69 = arith.constant 0 : index
      %c0_70 = arith.constant 0 : index
      %89 = vector.load %arg18[%c0_69, %c0_70] : memref<8x128xbf16, #tpu.memory_space<vmem>>, vector<8x128xbf16>
      tpu.vector_store %arg18[%c0_69, %c0_70], %88 {strides = array<i32>} : memref<8x128xbf16, #tpu.memory_space<vmem>>, vector<8x128xbf16>,
      %cst_71 = arith.constant dense<0xFF800000> : vector<8xf32>
      %90 = vector.multi_reduction <maximumf>, %87, %cst_71 [1] : vector<8x128xf32> to vector<8xf32>
      %91 = vector.shape_cast %90 : vector<8xf32> to vector<8x1xf32>
      %92 = vector.broadcast %91 : vector<8x1xf32> to vector<8x128xf32>
      %93 = arith.subf %87, %92 : vector<8x128xf32>
      %94 = math.exp %93 : vector<8x128xf32>
      %cst_72 = arith.constant dense<0.000000e+00> : vector<8xf32>
      %95 = vector.multi_reduction <add>, %94, %cst_72 [1] : vector<8x128xf32> to vector<8xf32>
      %96 = vector.shape_cast %95 : vector<8xf32> to vector<8x1xf32>
      %97 = math.log %96 : vector<8x1xf32>
      %98 = arith.addf %91, %97 : vector<8x1xf32>
      %99 = tpu.iota {dimensions = array<i32: 1>} : vector<8x128xi32>
      %c0_73 = arith.constant 0 : index
      %c0_74 = arith.constant 0 : index
      %100 = vector.load %arg6[%c0_73, %c0_74] : memref<8x1xi32, #tpu.memory_space<vmem>>, vector<8x1xi32>
      %101 = vector.broadcast %100 : vector<8x1xi32> to vector<8x128xi32>
      %102 = arith.cmpi eq, %99, %101 : vector<8x128xi32>
      %cst_75 = arith.constant 0.000000e+00 : f32
      %103 = vector.broadcast %cst_75 : f32 to vector<8x128xf32>
      %104 = arith.select %102, %87, %103 : vector<8x128xi1>, vector<8x128xf32>
      %cst_76 = arith.constant dense<0.000000e+00> : vector<8xf32>
      %105 = vector.multi_reduction <add>, %104, %cst_76 [1] : vector<8x128xf32> to vector<8xf32>
      %106 = vector.shape_cast %105 : vector<8xf32> to vector<8x1xf32>
      %107 = arith.subf %98, %106 : vector<8x1xf32>
      %108 = arith.mulf %7, %107 : vector<8x1xf32>
      %109 = vector.shape_cast %108 : vector<8x1xf32> to vector<1x8x1xf32>
      %cst_77 = arith.constant dense<0.000000e+00> : vector<1xf32>
      %110 = vector.multi_reduction <add>, %109, %cst_77 [1, 2] : vector<1x8x1xf32> to vector<1xf32>
      %111 = vector.shape_cast %110 : vector<1xf32> to vector<1x1x1xf32>
      %112 = vector.extract %111[0, 0, 0] : f32 from vector<1x1x1xf32>
      %113 = vector.broadcast %112 : f32 to vector<1x8x128xf32>
      %c0_78 = arith.constant 0 : index
      %c0_79 = arith.constant 0 : index
      %c0_80 = arith.constant 0 : index
      %114 = vector.load %arg20[%c0_78, %c0_79, %c0_80] : memref<1x8x128xf32, #tpu.memory_space<vmem>>, vector<1x8x128xf32>
      tpu.vector_store %arg20[%c0_78, %c0_79, %c0_80], %113 {strides = array<i32>} : memref<1x8x128xf32, #tpu.memory_space<vmem>>, vector<1x8x128xf32>,
    } else {
    }
    %c0 = arith.constant 0 : index
    %c0_2 = arith.constant 0 : index
    %11 = vector.load %arg21[%c0, %c0_2] : memref<8x128xbf16, #tpu.memory_space<vmem>>, vector<8x128xbf16>
    %c0_3 = arith.constant 0 : index
    %c0_4 = arith.constant 0 : index
    %12 = vector.load %arg11[%c0_3, %c0_4] : memref<128x128xbf16, #tpu.memory_space<vmem>>, vector<128x128xbf16>
    %cst = arith.constant dense<0.000000e+00> : vector<8x128xf32>
    %13 = tpu.matmul %11, %12, %cst {dimension_numbers = #tpu.dot_dimension_numbers<[1], [0], [0], [1], [0, 0, 1, 1], [], []>} : vector<8x128xbf16>, vector<128x128xbf16>, vector<8x128xf32> -> vector<8x128xf32>
    %c0_5 = arith.constant 0 : index
    %c0_6 = arith.constant 0 : index
    %14 = vector.load %arg12[%c0_5, %c0_6] : memref<1x128xf32, #tpu.memory_space<vmem>>, vector<1x128xf32>
    %15 = vector.broadcast %14 : vector<1x128xf32> to vector<8x128xf32>
    %16 = arith.addf %13, %15 : vector<8x128xf32>
    %17 = arith.truncf %16 : vector<8x128xf32> to vector<8x128xbf16>
    %c0_7 = arith.constant 0 : index
    %c0_8 = arith.constant 0 : index
    %18 = vector.load %arg17[%c0_7, %c0_8] : memref<8x128xbf16, #tpu.memory_space<vmem>>, vector<8x128xbf16>
    tpu.vector_store %arg17[%c0_7, %c0_8], %17 {strides = array<i32>} : memref<8x128xbf16, #tpu.memory_space<vmem>>, vector<8x128xbf16>,
    %c0_9 = arith.constant 0 : index
    %c0_10 = arith.constant 0 : index
    %19 = vector.load %arg22[%c0_9, %c0_10] : memref<8x1xf32, #tpu.memory_space<vmem>>, vector<8x1xf32>
    %cst_11 = arith.constant dense<0xFF800000> : vector<8xf32>
    %20 = vector.multi_reduction <maximumf>, %16, %cst_11 [1] : vector<8x128xf32> to vector<8xf32>
    %21 = vector.shape_cast %20 : vector<8xf32> to vector<8x1xf32>
    %22 = arith.maximumf %19, %21 : vector<8x1xf32>
    %c0_12 = arith.constant 0 : index
    %c0_13 = arith.constant 0 : index
    %23 = vector.load %arg22[%c0_12, %c0_13] : memref<8x1xf32, #tpu.memory_space<vmem>>, vector<8x1xf32>
    %24 = arith.subf %23, %22 : vector<8x1xf32>
    %25 = math.exp %24 : vector<8x1xf32>
    %c0_14 = arith.constant 0 : index
    %c0_15 = arith.constant 0 : index
    %26 = vector.load %arg23[%c0_14, %c0_15] : memref<8x1xf32, #tpu.memory_space<vmem>>, vector<8x1xf32>
    %27 = arith.mulf %25, %26 : vector<8x1xf32>
    %28 = vector.broadcast %22 : vector<8x1xf32> to vector<8x128xf32>
    %29 = arith.subf %16, %28 : vector<8x128xf32>
    %30 = math.exp %29 : vector<8x128xf32>
    %cst_16 = arith.constant dense<0.000000e+00> : vector<8xf32>
    %31 = vector.multi_reduction <add>, %30, %cst_16 [1] : vector<8x128xf32> to vector<8xf32>
    %32 = vector.shape_cast %31 : vector<8xf32> to vector<8x1xf32>
    %33 = arith.addf %27, %32 : vector<8x1xf32>
    %c0_17 = arith.constant 0 : index
    %c0_18 = arith.constant 0 : index
    %34 = vector.load %arg23[%c0_17, %c0_18] : memref<8x1xf32, #tpu.memory_space<vmem>>, vector<8x1xf32>
    tpu.vector_store %arg23[%c0_17, %c0_18], %33 {strides = array<i32>} : memref<8x1xf32, #tpu.memory_space<vmem>>, vector<8x1xf32>,
    %c0_19 = arith.constant 0 : index
    %c0_20 = arith.constant 0 : index
    %35 = vector.load %arg22[%c0_19, %c0_20] : memref<8x1xf32, #tpu.memory_space<vmem>>, vector<8x1xf32>
    tpu.vector_store %arg22[%c0_19, %c0_20], %22 {strides = array<i32>} : memref<8x1xf32, #tpu.memory_space<vmem>>, vector<8x1xf32>,
    %36 = tpu.iota {dimensions = array<i32: 1>} : vector<8x128xi32>
    %c128_i32 = arith.constant 128 : i32
    %37 = arith.muli %arg1, %c128_i32 : i32
    %38 = vector.broadcast %37 : i32 to vector<8x128xi32>
    %39 = arith.addi %36, %38 : vector<8x128xi32>
    %c0_21 = arith.constant 0 : index
    %c0_22 = arith.constant 0 : index
    %40 = vector.load %arg24[%c0_21, %c0_22] : memref<8x1xf32, #tpu.memory_space<vmem>>, vector<8x1xf32>
    %c0_23 = arith.constant 0 : index
    %c0_24 = arith.constant 0 : index
    %41 = vector.load %arg5[%c0_23, %c0_24] : memref<8x1xi32, #tpu.memory_space<vmem>>, vector<8x1xi32>
    %42 = vector.broadcast %41 : vector<8x1xi32> to vector<8x128xi32>
    %43 = arith.cmpi eq, %39, %42 : vector<8x128xi32>
    %cst_25 = arith.constant 0.000000e+00 : f32
    %44 = vector.broadcast %cst_25 : f32 to vector<8x128xf32>
    %45 = arith.select %43, %16, %44 : vector<8x128xi1>, vector<8x128xf32>
    %cst_26 = arith.constant dense<0.000000e+00> : vector<8xf32>
    %46 = vector.multi_reduction <add>, %45, %cst_26 [1] : vector<8x128xf32> to vector<8xf32>
    %47 = vector.shape_cast %46 : vector<8xf32> to vector<8x1xf32>
    %48 = arith.addf %40, %47 : vector<8x1xf32>
    %c0_27 = arith.constant 0 : index
    %c0_28 = arith.constant 0 : index
    %49 = vector.load %arg24[%c0_27, %c0_28] : memref<8x1xf32, #tpu.memory_space<vmem>>, vector<8x1xf32>
    tpu.vector_store %arg24[%c0_27, %c0_28], %48 {strides = array<i32>} : memref<8x1xf32, #tpu.memory_space<vmem>>, vector<8x1xf32>,
    %c0_i32_29 = arith.constant 0 : i32
    %50 = arith.cmpi eq, %arg1, %c0_i32_29 : i32
    %51 = arith.extui %50 : i1 to i32
    %c0_i32_30 = arith.constant 0 : i32
    %52 = arith.cmpi ne, %51, %c0_i32_30 : i32
    scf.if %52 {
      %c0_31 = arith.constant 0 : index
      %c0_32 = arith.constant 0 : index
      %53 = vector.load %arg22[%c0_31, %c0_32] : memref<8x1xf32, #tpu.memory_space<vmem>>, vector<8x1xf32>
      %c0_33 = arith.constant 0 : index
      %c0_34 = arith.constant 0 : index
      %54 = vector.load %arg23[%c0_33, %c0_34] : memref<8x1xf32, #tpu.memory_space<vmem>>, vector<8x1xf32>
      %55 = math.log %54 : vector<8x1xf32>
      %56 = arith.addf %53, %55 : vector<8x1xf32>
      %c0_35 = arith.constant 0 : index
      %c0_36 = arith.constant 0 : index
      %57 = vector.load %arg24[%c0_35, %c0_36] : memref<8x1xf32, #tpu.memory_space<vmem>>, vector<8x1xf32>
      %58 = arith.subf %56, %57 : vector<8x1xf32>
      %59 = arith.mulf %7, %58 : vector<8x1xf32>
      %60 = vector.shape_cast %59 : vector<8x1xf32> to vector<1x8x1xf32>
      %cst_37 = arith.constant dense<0.000000e+00> : vector<1xf32>
      %61 = vector.multi_reduction <add>, %60, %cst_37 [1, 2] : vector<1x8x1xf32> to vector<1xf32>
      %62 = vector.shape_cast %61 : vector<1xf32> to vector<1x1x1xf32>
      %63 = vector.extract %62[0, 0, 0] : f32 from vector<1x1x1xf32>
      %64 = vector.broadcast %63 : f32 to vector<1x8x128xf32>
      %c0_38 = arith.constant 0 : index
      %c0_39 = arith.constant 0 : index
      %c0_40 = arith.constant 0 : index
      %65 = vector.load %arg19[%c0_38, %c0_39, %c0_40] : memref<1x8x128xf32, #tpu.memory_space<vmem>>, vector<1x8x128xf32>
      tpu.vector_store %arg19[%c0_38, %c0_39, %c0_40], %64 {strides = array<i32>} : memref<1x8x128xf32, #tpu.memory_space<vmem>>, vector<1x8x128xf32>,
    } else {
    }
    return
  }
  func.func @transform_0(%arg0: i32, %arg1: i32) -> (i32, i32) {
    %c0_i32 = arith.constant 0 : i32
    %c0_i32_0 = arith.constant 0 : i32
    return %arg0, %c0_i32 : i32, i32
  }
  func.func @transform_1(%arg0: i32, %arg1: i32) -> (i32, i32) {
    %c0_i32 = arith.constant 0 : i32
    %c0_i32_0 = arith.constant 0 : i32
    return %arg0, %c0_i32 : i32, i32
  }
  func.func @transform_2(%arg0: i32, %arg1: i32) -> (i32, i32) {
    %c0_i32 = arith.constant 0 : i32
    %c0_i32_0 = arith.constant 0 : i32
    return %arg0, %c0_i32 : i32, i32
  }
  func.func @transform_3(%arg0: i32, %arg1: i32) -> (i32, i32) {
    %c0_i32 = arith.constant 0 : i32
    %c0_i32_0 = arith.constant 0 : i32
    return %arg0, %c0_i32 : i32, i32
  }
  func.func @transform_4(%arg0: i32, %arg1: i32) -> (i32, i32) {
    %c0_i32 = arith.constant 0 : i32
    %c0_i32_0 = arith.constant 0 : i32
    return %arg0, %c0_i32 : i32, i32
  }
  func.func @transform_5(%arg0: i32, %arg1: i32) -> (i32, i32) {
    %c0_i32 = arith.constant 0 : i32
    %c0_i32_0 = arith.constant 0 : i32
    %c0_i32_1 = arith.constant 0 : i32
    return %c0_i32, %c0_i32_0 : i32, i32
  }
  func.func @transform_6(%arg0: i32, %arg1: i32) -> (i32, i32) {
    %c0_i32 = arith.constant 0 : i32
    %c0_i32_0 = arith.constant 0 : i32
    %c0_i32_1 = arith.constant 0 : i32
    return %c0_i32, %c0_i32_0 : i32, i32
  }
  func.func @transform_7(%arg0: i32, %arg1: i32) -> (i32, i32) {
    %c0_i32 = arith.constant 0 : i32
    %c0_i32_0 = arith.constant 0 : i32
    %c0_i32_1 = arith.constant 0 : i32
    return %c0_i32, %c0_i32_0 : i32, i32
  }
  func.func @transform_8(%arg0: i32, %arg1: i32) -> (i32, i32) {
    %c0_i32 = arith.constant 0 : i32
    %c0_i32_0 = arith.constant 0 : i32
    %c0_i32_1 = arith.constant 0 : i32
    return %c0_i32, %c0_i32_0 : i32, i32
  }
  func.func @transform_9(%arg0: i32, %arg1: i32) -> (i32, i32) {
    %c0_i32 = arith.constant 0 : i32
    %c0_i32_0 = arith.constant 0 : i32
    return %c0_i32, %arg1 : i32, i32
  }
  func.func @transform_10(%arg0: i32, %arg1: i32) -> (i32, i32) {
    %c0_i32 = arith.constant 0 : i32
    %c0_i32_0 = arith.constant 0 : i32
    return %c0_i32, %arg1 : i32, i32
  }
  func.func @transform_11(%arg0: i32, %arg1: i32) -> (i32, i32) {
    %c0_i32 = arith.constant 0 : i32
    %c0_i32_0 = arith.constant 0 : i32
    %c0_i32_1 = arith.constant 0 : i32
    return %c0_i32, %c0_i32_0 : i32, i32
  }
  func.func @transform_12(%arg0: i32, %arg1: i32) -> (i32, i32) {
    %c0_i32 = arith.constant 0 : i32
    %c0_i32_0 = arith.constant 0 : i32
    %c0_i32_1 = arith.constant 0 : i32
    return %c0_i32, %c0_i32_0 : i32, i32
  }
  func.func @transform_13(%arg0: i32, %arg1: i32) -> (i32, i32) {
    %c0_i32 = arith.constant 0 : i32
    %c0_i32_0 = arith.constant 0 : i32
    %c0_i32_1 = arith.constant 0 : i32
    return %c0_i32, %c0_i32_0 : i32, i32
  }
  func.func @transform_14(%arg0: i32, %arg1: i32) -> (i32, i32) {
    %c0_i32 = arith.constant 0 : i32
    %c0_i32_0 = arith.constant 0 : i32
    %c0_i32_1 = arith.constant 0 : i32
    return %c0_i32, %c0_i32_0 : i32, i32
  }
  func.func @transform_15(%arg0: i32, %arg1: i32) -> (i32, i32) {
    %c0_i32 = arith.constant 0 : i32
    return %arg0, %arg1 : i32, i32
  }
  func.func @transform_16(%arg0: i32, %arg1: i32) -> (i32, i32) {
    %c0_i32 = arith.constant 0 : i32
    %c0_i32_0 = arith.constant 0 : i32
    return %arg0, %c0_i32 : i32, i32
  }
  func.func @transform_17(%arg0: i32, %arg1: i32) -> (i32, i32, i32) {
    %c0_i32 = arith.constant 0 : i32
    %c0_i32_0 = arith.constant 0 : i32
    %c0_i32_1 = arith.constant 0 : i32
    return %arg0, %c0_i32, %c0_i32_0 : i32, i32, i32
  }
  func.func @transform_18(%arg0: i32, %arg1: i32) -> (i32, i32, i32) {
    %c0_i32 = arith.constant 0 : i32
    %c0_i32_0 = arith.constant 0 : i32
    %c0_i32_1 = arith.constant 0 : i32
    return %arg0, %c0_i32, %c0_i32_0 : i32, i32, i32
  }
}

</mosaic_0001>

<bundles_post_ra>
// kernel: tpu_custom_call.1
= control target key start
LH: loop header
LB: loop body
LE: loop exit
PB: predicated region body
PF: predicated region fallthrough
CT: control target
= control target key end

     0   :  { %s1436_s0 = inlined_call_operand.hbm [shape: bf16[8,32], index: 0, kind: input, shape index: {}]   ;;  %s1437_s1 = inlined_call_operand.hbm [shape: bf16[8,8], index: 1, kind: input, shape index: {}]   ;;  %s1438_s2 = inlined_call_operand.hbm [shape: bf16[8,8], index: 2, kind: input, shape index: {}]   ;;  %s1439_s3 = inlined_call_operand.vmem [shape: s32[8,1], index: 3, kind: input, shape index: {}]   ;;  %s1440_s4 = inlined_call_operand.vmem [shape: s32[8,1], index: 4, kind: input, shape index: {}]   ;;  %s1441_s5 = inlined_call_operand.vmem [shape: bf16[32,128], index: 5, kind: input, shape index: {}]   ;;  %s1442_s6 = inlined_call_operand.hbm [shape: bf16[8,128], index: 6, kind: input, shape index: {}]   ;;  %s1443_s7 = inlined_call_operand.hbm [shape: bf16[8,128], index: 7, kind: input, shape index: {}]   ;;  %s1444_s8 = inlined_call_operand.vmem [shape: f32[1,128], index: 8, kind: input, shape index: {}]   ;;  %s1445_s9 = inlined_call_operand.hbm [shape: bf16[128,128], index: 9, kind: input, shape index: {}]   ;;  %s1446_s10 = inlined_call_operand.vmem [shape: f32[1,128], index: 10, kind: input, shape index: {}]   ;;  %s1447_s11 = inlined_call_operand.vmem [shape: bf16[32,48], index: 11, kind: input, shape index: {}]   ;;  %s1448_s12 = inlined_call_operand.vmem [shape: f32[1,48], index: 12, kind: input, shape index: {}]   ;;  %s1449_s13 = inlined_call_operand.vmem [shape: bf16[48,128], index: 13, kind: input, shape index: {}]   ;;  %s1450_s14 = inlined_call_operand.vmem [shape: f32[1,128], index: 14, kind: input, shape index: {}]   ;;  %s1451_s15 = inlined_call_operand.hbm [shape: bf16[8,128], index: 15, kind: output, shape index: {0}]   ;;  %s1452_s16 = inlined_call_operand.hbm [shape: bf16[8,128], index: 16, kind: output, shape index: {1}]   ;;  %s1453_s17 = inlined_call_operand.hbm [shape: f32[1,8,128], index: 17, kind: output, shape index: {2}]   ;;  %s1454_s18 = inlined_call_operand.hbm [shape: f32[1,8,128], index: 18, kind: output, shape index: {3}]  }
   0x1   :  { %1458 = sst [smem:[#allocation30_spill]] %s1436_s0 }
   0x2   :  { %1459 = sst [smem:[#allocation31_spill]] %s1437_s1 }
   0x3   :  { %1460 = sst [smem:[#allocation32_spill]] %s1438_s2 }
   0x4   :  { %24 = vsyncpa [#allocation7], 0 }
   0x5   :  { %25 = vsyncpa [#allocation10], 0 }
   0x6   :  { %26 = vsyncpa [#allocation13], 0 }
   0x7   :  { %27 = vsyncpa [#allocation16], 0 }
   0x8   :  { %28 = vsyncpa [#allocation8], 0 }
   0x9   :  { %29 = vsyncpa [#allocation19], 0 }
   0xa   :  { %30 = vsyncpa [#allocation22], 0  ;;  %s1118_s27 = smov [#allocation9]   ;;  %s1119_s29 = smov [#allocation12]  }
   0xb   :  { %s47_s28 = sshll.u32 %s1118_s27, 4  ;;  %s73_s30 = sshll.u32 %s1119_s29, 4  ;;  %s48_s28 = int_to_ptr.vmem [resolvable:$true] %s47_s28  ;;  %s74_s30 = int_to_ptr.vmem [resolvable:$true] %s73_s30 }
   0xc   :  { %s1461_s1 = sld [smem:[#allocation31_spill]] }
  0x12   :  { %s884_s20 = scalar_lea.hbm %s1461_s1, 64 }
  0x13   :  { %p885_p0 = scmp.ne.s32.totalorder %s1461_s1, %s884_s20  ;;  %p888_p1 = scmp.lt.u32.totalorder %s884_s20, %s1461_s1 }
  0x15   :  { %p890_p2 = pnand %p888_p1, %p885_p0 }
  0x17   :  { %893 = shalt.err (!%p890_p2)
}
  0x18   :  { %s894_s24 = scalar_lea.vmem %s48_s28, 64  ;;  %p899_p4 = scmp.lt.s32.totalorder %s48_s28, %s48_s28 }
  0x19   :  { %p895_p3 = scmp.ne.s32.totalorder %s48_s28, %s894_s24  ;;  %p900_p5 = scmp.lt.s32.totalorder %s894_s24, %s894_s24 }
  0x1b   :  { %p901_p6 = por %p900_p5, %p899_p4 }
  0x1d   :  { %p902_p7 = pnand %p901_p6, %p895_p3 }
  0x1f   :  { %905 = shalt.err (!%p902_p7)
}
  0x20   :  { %50 = dma.hbm_to_vmem [thread:$0]  %s1461_s1, 64, %s48_s28, [#allocation10]  }
  0x21   :  { %s906_s0 = scalar_lea.hbm %s1442_s6, 64 }
  0x22   :  { %p907_p8 = scmp.ne.s32.totalorder %s1442_s6, %s906_s0  ;;  %p910_p9 = scmp.lt.u32.totalorder %s906_s0, %s1442_s6 }
  0x24   :  { %p912_p10 = pnand %p910_p9, %p907_p8 }
  0x26   :  { %915 = shalt.err (!%p912_p10)
}
  0x27   :  { %s916_s2 = scalar_lea.vmem %s74_s30, 64  ;;  %p921_p12 = scmp.lt.s32.totalorder %s74_s30, %s74_s30 }
  0x28   :  { %p917_p11 = scmp.ne.s32.totalorder %s74_s30, %s916_s2  ;;  %p922_p13 = scmp.lt.s32.totalorder %s916_s2, %s916_s2 }
  0x2a   :  { %p923_p0 = por %p922_p13, %p921_p12 }
  0x2c   :  { %p924_p1 = pnand %p923_p0, %p917_p11 }
  0x2e   :  { %927 = shalt.err (!%p924_p1)
}
  0x2f   :  { %76 = dma.hbm_to_vmem [thread:$0]  %s1442_s6, 64, %s74_s30, [#allocation13]  }
  0x30   :  { %s1120_s23 = smov [#allocation6]   ;;  %s1121_s25 = smov [#allocation11]  }
  0x31   :  { %s37_s24 = sshll.u32 %s1120_s23, 4  ;;  %s57_s26 = sshll.u32 %s1121_s25, 4  ;;  %s38_s24 = int_to_ptr.vmem [resolvable:$true] %s37_s24  ;;  %s58_s26 = int_to_ptr.vmem [resolvable:$true] %s57_s26 }
  0x32   :  { %s1462_s0 = sld [smem:[#allocation30_spill]] }
  0x38   :  { %s928_s19 = scalar_lea.hbm %s1462_s0, 64 }
  0x39   :  { %p929_p2 = scmp.ne.s32.totalorder %s1462_s0, %s928_s19  ;;  %p932_p3 = scmp.lt.u32.totalorder %s928_s19, %s1462_s0 }
  0x3b   :  { %p934_p4 = pnand %p932_p3, %p929_p2 }
  0x3d   :  { %937 = shalt.err (!%p934_p4)
}
  0x3e   :  { %s938_s6 = scalar_lea.vmem %s38_s24, 64  ;;  %p943_p6 = scmp.lt.s32.totalorder %s38_s24, %s38_s24 }
  0x3f   :  { %p939_p5 = scmp.ne.s32.totalorder %s38_s24, %s938_s6  ;;  %p944_p7 = scmp.lt.s32.totalorder %s938_s6, %s938_s6 }
  0x41   :  { %p945_p8 = por %p944_p7, %p943_p6 }
  0x43   :  { %p946_p9 = pnand %p945_p8, %p939_p5 }
  0x45   :  { %949 = shalt.err (!%p946_p9)
}
  0x46   :  { %40 = dma.hbm_to_vmem [thread:$0]  %s1462_s0, 64, %s38_s24, [#allocation7]  }
  0x47   :  { %s1463_s25 = sld [smem:[#allocation32_spill]] }
  0x4d   :  { %s950_s27 = scalar_lea.hbm %s1463_s25, 64 }
  0x4e   :  { %p951_p10 = scmp.ne.s32.totalorder %s1463_s25, %s950_s27  ;;  %p954_p11 = scmp.lt.u32.totalorder %s950_s27, %s1463_s25 }
  0x50   :  { %p956_p12 = pnand %p954_p11, %p951_p10 }
  0x52   :  { %959 = shalt.err (!%p956_p12)
}
  0x53   :  { %s960_s22 = scalar_lea.vmem %s58_s26, 64  ;;  %p965_p0 = scmp.lt.s32.totalorder %s58_s26, %s58_s26 }
  0x54   :  { %p961_p13 = scmp.ne.s32.totalorder %s58_s26, %s960_s22  ;;  %p966_p1 = scmp.lt.s32.totalorder %s960_s22, %s960_s22 }
  0x56   :  { %p967_p2 = por %p966_p1, %p965_p0 }
  0x58   :  { %p968_p3 = pnand %p967_p2, %p961_p13 }
  0x5a   :  { %971 = shalt.err (!%p968_p3)
}
  0x5b   :  { %60 = dma.hbm_to_vmem [thread:$0]  %s1463_s25, 64, %s58_s26, [#allocation10]  }
  0x5c   :  { %s1122_s2 = smov [#allocation14]   ;;  %s1123_s30 = smov [#allocation15]  }
  0x5d   :  { %s83_s6 = sshll.u32 %s1122_s2, 4  ;;  %s94_s28 = sshll.u32 %s1123_s30, 4  ;;  %s84_s6 = int_to_ptr.vmem [resolvable:$true] %s83_s6  ;;  %s1277_s28 = int_to_ptr.vmem [resolvable:$true] %s94_s28 }
  0x5e   :  { %s972_s27 = scalar_lea.hbm %s1443_s7, 64 }
  0x5f   :  { %p973_p4 = scmp.ne.s32.totalorder %s1443_s7, %s972_s27  ;;  %p976_p5 = scmp.lt.u32.totalorder %s972_s27, %s1443_s7 }
  0x61   :  { %p978_p6 = pnand %p976_p5, %p973_p4 }
  0x63   :  { %981 = shalt.err (!%p978_p6)
}
  0x64   :  { %s982_s26 = scalar_lea.vmem %s84_s6, 64  ;;  %p987_p8 = scmp.lt.s32.totalorder %s84_s6, %s84_s6 }
  0x65   :  { %p983_p7 = scmp.ne.s32.totalorder %s84_s6, %s982_s26  ;;  %p988_p9 = scmp.lt.s32.totalorder %s982_s26, %s982_s26 }
  0x67   :  { %p989_p10 = por %p988_p9, %p987_p8 }
  0x69   :  { %p990_p11 = pnand %p989_p10, %p983_p7 }
  0x6b   :  { %993 = shalt.err (!%p990_p11)
}
  0x6c   :  { %86 = dma.hbm_to_vmem [thread:$0]  %s1443_s7, 64, %s84_s6, [#allocation13]  }
  0x6d   :  { %s994_s2 = scalar_lea.hbm %s1445_s9, 1024 }
  0x6e   :  { %p995_p12 = scmp.ne.s32.totalorder %s1445_s9, %s994_s2  ;;  %p998_p13 = scmp.lt.u32.totalorder %s994_s2, %s1445_s9 }
  0x70   :  { %p1000_p0 = pnand %p998_p13, %p995_p12 }
  0x72   :  { %1003 = shalt.err (!%p1000_p0)
}
  0x73   :  { %s1004_s29 = scalar_lea.vmem %s1277_s28, 1024  ;;  %p1009_p2 = scmp.lt.s32.totalorder %s1277_s28, %s1277_s28 }
  0x74   :  { %p1005_p1 = scmp.ne.s32.totalorder %s1277_s28, %s1004_s29  ;;  %p1010_p3 = scmp.lt.s32.totalorder %s1004_s29, %s1004_s29 }
  0x76   :  { %p1011_p4 = por %p1010_p3, %p1009_p2 }
  0x78   :  { %p1012_p5 = pnand %p1011_p4, %p1005_p1 }
  0x7a   :  { %1015 = shalt.err (!%p1012_p5)
}
  0x7b   :  { %s1124_s7 = smov 64   ;;  %s1125_s6 = smov 4  }
  0x7c   :  { %100 = dma.hbm_to_vmem [thread:$0]  %s1445_s9, 1024, %s1277_s28, [#allocation16], %s1124_s7, %s1124_s7, %s1125_s6  }
  0x7d   :  { %1104 = dma.done.wait [#allocation7], 64  }
  0x7e   :  { %1105 = vsyncadd [#allocation7], 4294967232 }
  0x7f   :  { %1106 = dma.done.wait [#allocation10], 128  }
  0x80   :  { %1107 = vsyncadd [#allocation10], 4294967168 }
  0x81   :  { %1108 = dma.done.wait [#allocation13], 128  }
  0x82   :  { %1109 = vsyncadd [#allocation13], 4294967168 }
  0x83   :  { %1110 = dma.done.wait [#allocation16], 1024  }
  0x84   :  { %1111 = vsyncadd [#allocation16], 4294966272  ;;  %v1126_v0 = vmov 0.0   ;;  %vm1127_vm0 = vmmov 0   ;;  %vm153_vm1 = vcmask 1043456   ;;  %v855_v4 = vld [vmem:[%s1447_s11] sm:$0xff]  }
  0x85   :  { %775 = vmatprep.subr.bf16.mxu0 %v1126_v0  ;;  %795 = vmatprep.subr.bf16.mxu1 %v1126_v0  ;;  %v148_v1 = vld [vmem:[#allocation12] sm:$0xf]  ;;  %v254_v2 = vld [vmem:[#allocation14] sm:$0xf]  ;;  %vm149_vm2 = vcmask 64512   ;;  %v856_v5 = vld [vmem:[%s1441_s5] sm:$0xff]  }
  0x86   :  { %777 = vmatprep.mubr.msk.bf16.mxu0 %vm1127_vm0, %v1126_v0  ;;  %799 = vmatprep.mubr.msk.bf16.mxu1 %vm1127_vm0, %v1126_v0  ;;  %v155_v3 = vsel %vm153_vm1, %v148_v1, 0  ;;  %v147_v6 = vld [vmem:[#allocation9] sm:$0xf]  ;;  %v857_v7 = vld [vmem:[%s1447_s11 + $0x8] sm:$0xff]   ;;  %vm209_vm3 = vcmask 261120   ;;  %v259_v8 = vsel %vm153_vm1, %v254_v2, 0 }
  0x87   :  { %776 = vmatpush3.bf16.msra.mxu0 %v155_v3  ;;  %796 = vmatpush3.bf16.msra.mxu1 %v855_v4  ;;  %v858_v9 = vld [vmem:[%s1441_s5 + $0x8] sm:$0xff]   ;;  %v142_v10 = vld [vmem:[#allocation6] sm:$0xf]  ;;  %v253_v11 = vld [vmem:[#allocation11] sm:$0xf]  ;;  %vm413_vm4 = vcmask 392192  }
  0x88   :  { %781 = vmatprep.subr.bf16.mxu0 %v1126_v0  ;;  %797 = vmatprep.subr.bf16.mxu1 %v1126_v0  ;;  %v859_v12 = vld [vmem:[%s1449_s13] sm:$0xff]   ;;  %v860_v13 = vld [vmem:[#allocation15] sm:$0xff]   ;;  %v861_v14 = vld [vmem:[%s1449_s13 + $0x8] sm:$0xff]   ;;  %v1128_v50 = vmov 0   ;;  %vm313_vm5 = vcmask 7168  }
  0x89   :  { %v862_v15 = vld [vmem:[#allocation15 + $0x8] sm:$0xff]   ;;  %v863_v16 = vld [vmem:[%s1449_s13 + $0x10] sm:$0xff]   ;;  %v864_v17 = vld [vmem:[#allocation15 + $0x10] sm:$0xff]   ;;  %854 = vset.pattern.permute.xlu1 %v1128_v50  ;;  %853 = vset.pattern.permute.xlu0 %v1128_v50  ;;  %v1129_v3 = vmov -1e+30   ;;  %315 = vst.msk [vmem:[#allocation4] sm:$0xff] %vm313_vm5, %v1126_v0 }
  0x8a   :  { %778 = vmatmul.mubr.msk.bf16.vlgmr.msra.gmra.mrb[0].mxu0 %vm149_vm2, %v147_v6  ;;  %v865_v18 = vld [vmem:[#allocation15 + $0x18] sm:$0xff]   ;;  %v866_v19 = vld [vmem:[#allocation15 + $0x20] sm:$0xff]   ;;  %v867_v20 = vld [vmem:[#allocation15 + $0x28] sm:$0xff]   ;;  %314 = vst.msk [vmem:[#allocation3] sm:$0xff] %vm313_vm5, %v1129_v3 }
  0x8b   :  { %782 = vmatpush3.bf16.msra.mxu0 %v856_v5  ;;  %785 = vmatprep.mubr.msk.bf16.mxu0 %vm1127_vm0, %v1126_v0  ;;  %v868_v21 = vld [vmem:[#allocation15 + $0x30] sm:$0xff]   ;;  %v869_v22 = vld [vmem:[#allocation15 + $0x38] sm:$0xff]   ;;  %316 = vst.msk [vmem:[#allocation5] sm:$0xff] %vm313_vm5, %v1126_v0 }
  0x8c   :  { %798 = vmatpush3.bf16.msra.mxu1 %v857_v7  ;;  %783 = vmatprep.subr.bf16.mxu0 %v1126_v0  ;;  %v734_v27 = vld [vmem:[%s1448_s12] ss:$0 sm:$0xff] }
  0x8d   :  { %813 = vmatprep.subr.bf16.mxu1 %v1126_v0  ;;  %v733_v39 = vld [vmem:[%s1444_s8] ss:$0 sm:$0xff] }
  0x8e   :  { %v738_v51 = vld [vmem:[%s1450_s14] ss:$0 sm:$0xff] }
  0x8f   :  { %784 = vmatpush3.bf16.msra.mxu0 %v858_v9  ;;  %800 = vmatmul.mubr.msk.bf16.vlgmr.msra.gmra.mrb[0].mxu1 %vm209_vm3, %v142_v10  ;;  %v636_v57 = vld [vmem:[%s1439_s3] sm:$0xff]  ;;  %s1130_s3 = smov [#allocation18]  }
  0x90   :  { %789 = vmatprep.subr.bf16.mxu0 %v1126_v0  ;;  %829 = vmatprep.mubr.msk.bf16.mxu1 %vm1127_vm0, %v1126_v0  ;;  %v743_v58 = vld [vmem:[%s1446_s10] ss:$0 sm:$0xff]  ;;  %s1131_s10 = smov [#allocation17]  }
  0x91   :  { %814 = vmatpush3.bf16.msra.mxu1 %v860_v13  ;;  %v471_v60 = vld [vmem:[%s1440_s4] sm:$0xff]  ;;  %s685_s4 = sshll.u32 %s1130_s3, 4  ;;  %s675_s14 = sshll.u32 %s1131_s10, 4  ;;  %s686_s4 = int_to_ptr.vmem [resolvable:$true] %s685_s4  ;;  %s676_s14 = int_to_ptr.vmem [resolvable:$true] %s675_s14 }
  0x92   :  { %786 = vmatmul.mubr.msk.bf16.vlgmr.msra.gmra.mrb[4].mxu0 %vm209_vm3, %v142_v10  ;;  %815 = vmatprep.subr.bf16.mxu1 %v1126_v0  ;;  %v607_v5 = vld [vmem:[#allocation3] sm:$0xff]  ;;  %s1016_s26 = scalar_lea.vmem %s686_s4, 64  ;;  %p1021_p7 = scmp.lt.s32.totalorder %s686_s4, %s686_s4 }
  0x93   :  { %790 = vmatpush3.bf16.msra.mxu0 %v259_v8  ;;  %791 = vmatprep.mubr.msk.bf16.mxu0 %vm1127_vm0, %v1126_v0  ;;  %p1017_p6 = scmp.ne.s32.totalorder %s686_s4, %s1016_s26  ;;  %p1022_p8 = scmp.lt.s32.totalorder %s1016_s26, %s1016_s26 }
  0x94   :  { %803 = vmatprep.subr.bf16.mxu0 %v1126_v0 }
  0x95   :  { %816 = vmatpush3.bf16.msra.mxu1 %v862_v15  ;;  %p1023_p9 = por %p1022_p8, %p1021_p7 }
  0x96   :  { %817 = vmatprep.subr.bf16.mxu1 %v1126_v0 }
  0x97   :  { %p1024_p10 = pnand %p1023_p9, %p1017_p6 }
  0x99   :  { %818 = vmatpush3.bf16.msra.mxu1 %v864_v17 }
  0x9a   :  { %792 = vmatmul.mubr.msk.bf16.vlgmr.msra.gmra.mrb[8].mxu0 %vm149_vm2, %v253_v11  ;;  %819 = vmatprep.subr.bf16.mxu1 %v1126_v0 }
  0x9b   :  { %809 = vmatprep.mubr.msk.bf16.mxu0 %vm1127_vm0, %v1126_v0  ;;  %804 = vmatpush3.bf16.msra.mxu0 %v859_v12 }
  0x9c   :  { %805 = vmatprep.subr.bf16.mxu0 %v1126_v0 }
  0x9d   :  { %820 = vmatpush3.bf16.msra.mxu1 %v865_v18 }
  0x9e   :  { %821 = vmatprep.subr.bf16.mxu1 %v1126_v0 }
  0x9f   :  { %806 = vmatpush3.bf16.msra.mxu0 %v861_v14 }
  0xa0   :  { %807 = vmatprep.subr.bf16.mxu0 %v1126_v0 }
  0xa1   :  { %822 = vmatpush3.bf16.msra.mxu1 %v866_v19 }
  0xa2   :  { %823 = vmatprep.subr.bf16.mxu1 %v1126_v0 }
  0xa3   :  { %808 = vmatpush3.bf16.msra.mxu0 %v863_v16 }
  0xa5   :  { %824 = vmatpush3.bf16.msra.mxu1 %v867_v20 }
  0xa6   :  { %825 = vmatprep.subr.bf16.mxu1 %v1126_v0 }
  0xa9   :  { %826 = vmatpush3.bf16.msra.mxu1 %v868_v21 }
  0xaa   :  { %827 = vmatprep.subr.bf16.mxu1 %v1126_v0  ;;  %v469_v0 = vlaneseq }
  0xac   :  { %v470_v16 = vand.u32 127, %v469_v0 }
  0xad   :  { %828 = vmatpush3.bf16.msra.mxu1 %v869_v22 }
 0x15d   :  { %v191_v23 = vpop.f32.mrb[0].mxu0 }
 0x15e   :  { %v779_v24 = vpop.f32.mrb[1].mxu0 }
 0x15f   :  { %v194_v25 = vpop.f32.mrb[2].mxu0 }
 0x160   :  { %v780_v26 = vpop.f32.mrb[3].mxu0  ;;  %v614_v25 = vld [vmem:[#allocation4] sm:$0xff] }
 0x162   :  { %v374_v28 = vpop.f32.mrb[0].mxu1 }
 0x163   :  { %v375_v29 = vadd.f32 %v734_v27, %v374_v28  ;;  %v801_v30 = vpop.f32.mrb[1].mxu1 }
 0x164   :  { %v377_v31 = vpop.f32.mrb[2].mxu1  ;;  %v635_v30 = vld [vmem:[#allocation5] sm:$0xff] }
 0x165   :  { %870 = vtanh.f32 %v375_v29  ;;  %v247_v32 = vpop.f32.mrb[4].mxu0  ;;  %v802_v33 = vpop.f32.mrb[3].mxu1 }
 0x166   :  { %v248_v34 = vadd.f32 %v247_v32, %v191_v23  ;;  %v787_v35 = vpop.f32.mrb[5].mxu0 }
 0x167   :  { %v250_v36 = vpop.f32.mrb[6].mxu0 }
 0x168   :  { %v788_v37 = vpop.f32.mrb[7].mxu0 }
 0x16d   :  { %v295_v38 = vpop.f32.mrb[8].mxu0 }
 0x16e   :  { %v301_v40 = vadd.f32 %v295_v38, %v248_v34  ;;  %v793_v41 = vpop.f32.mrb[9].mxu0 }
 0x16f   :  { %v871_v42 = vpop.eup %870  ;;  %v298_v43 = vpop.f32.mrb[10].mxu0 }
 0x170   :  { %v381_v44 = vpack.c.bf16 %v871_v42, %v871_v42  ;;  %v309_v45 = vadd.f32 %v733_v39, %v301_v40  ;;  %v794_v46 = vpop.f32.mrb[11].mxu0 }
 0x172   :  { %872 = vtanh.f32 %v309_v45  ;;  %810 = vmatmul.mubr.msk.bf16.vlgmr.msra.gmra.mrb[12].mxu0 %vm413_vm4, %v381_v44 }
 0x17c   :  { %v873_v47 = vpop.eup %872 }
 0x17d   :  { %v311_v48 = vpack.c.bf16 %v873_v47, %v873_v47 }
 0x17f   :  { %312 = vst [vmem:[#allocation2] sm:$0xf] %v311_v48 }
 0x186   :  { %v493_v49 = vld [vmem:[#allocation2] sm:$0xf] }
 0x187   :  { %830 = vmatmul.mubr.bf16.vlgmr.msra.gmra.mrb[4].mxu1 %v493_v49 }
 0x245   :  { %v451_v52 = vpop.f32.mrb[12].mxu0 }
 0x246   :  { %v452_v53 = vadd.f32 %v738_v51, %v451_v52  ;;  %v811_v54 = vpop.f32.mrb[13].mxu0 }
 0x247   :  { %v454_v55 = vpop.f32.mrb[14].mxu0 }
 0x248   :  { %459 = vmax.xlane.f32.xlu1 %v452_v53  ;;  %v812_v56 = vpop.f32.mrb[15].mxu0  ;;  %v457_v4 = vpack.c.bf16 %v452_v53, %v452_v53 }
 0x24a   :  { %458 = vst [vmem:[#allocation18] sm:$0xf] %v457_v4 }
 0x259   :  { %638 = vperm.xlu1 %854, %v636_v57  }
 0x25a   :  { %v599_v59 = vpop.f32.mrb[4].mxu1 }
 0x25b   :  { %v600_v61 = vadd.f32 %v743_v58, %v599_v59  ;;  %v831_v62 = vpop.f32.mrb[5].mxu1 }
 0x25c   :  { %v602_v63 = vpop.f32.mrb[6].mxu1 }
 0x25d   :  { %608 = vmax.xlane.f32.xlu0 %v600_v61  ;;  %v832_v1 = vpop.f32.mrb[7].mxu1  ;;  %473 = vperm.xlu1 %854, %v471_v60   ;;  %v605_v2 = vpack.c.bf16 %v600_v61, %v600_v61 }
 0x25f   :  { %606 = vst [vmem:[#allocation17] sm:$0xf] %v605_v2 }
 0x2d5   :  { %v460_v9 = vpop.xlane.xlu1 %459 }
 0x2d6   :  { %v461_v10 = vsub.f32 %v452_v53, %v460_v9 }
 0x2d8   :  { %v462_v11 = vmul.f32 1.442695, %v461_v10 }
 0x2d9   :  { %v639_v17 = vpop.permute.xlu1 %638 }
 0x2da   :  { %874 = vpow2.f32 %v462_v11  ;;  %vm640_vm6 = vcmp.eq.s32.totalorder %v470_v16, %v639_v17 }
 0x2db   :  { %v641_v20 = vsel %vm640_vm6, %v600_v61, 0.0 }
 0x2dd   :  { %v474_v19 = vpop.permute.xlu1 %473 }
 0x2de   :  { %vm475_vm7 = vcmp.eq.s32.totalorder %v470_v16, %v474_v19 }
 0x2df   :  { %v476_v21 = vsel %vm475_vm7, %v452_v53, 0.0 }
 0x2e4   :  { %v875_v12 = vpop.eup %874 }
 0x2ea   :  { %v609_v6 = vpop.xlane.xlu0 %608 }
 0x2eb   :  { %v610_v7 = vmax.f32 %v607_v5, %v609_v6 }
 0x2ed   :  { %v611_v8 = vsub.f32 %v607_v5, %v610_v7  ;;  %629 = vst.msk [vmem:[#allocation3] sm:$0xff] %vm313_vm5, %v610_v7  ;;  %618 = vperm.xlu0 %853, %v610_v7  }
 0x2ef   :  { %v612_v22 = vmul.f32 1.442695, %v611_v8 }
 0x2f4   :  { %v649_v41 = vld [vmem:[#allocation3] sm:$0xff] }
 0x30c   :  { %464 = vadd.xlane.f32.xlu0 %v875_v12 }
 0x36c   :  { %v619_v13 = vpop.permute.xlu0 %618 }
 0x36d   :  { %v621_v14 = vsub.f32 %v600_v61, %v619_v13 }
 0x36f   :  { %v622_v15 = vmul.f32 1.442695, %v621_v14 }
 0x371   :  { %876 = vpow2.f32 %v622_v15 }
 0x372   :  { %878 = vpow2.f32 %v612_v22 }
 0x37b   :  { %v877_v18 = vpop.eup %876 }
 0x37c   :  { %624 = vadd.xlane.f32.xlu1 %v877_v18  ;;  %v879_v24 = vpop.eup %878 }
 0x37d   :  { %v615_v26 = vmul.f32 %v879_v24, %v614_v25 }
 0x380   :  { %642 = vadd.xlane.f32.xlu1 %v641_v20 }
 0x384   :  { %477 = vadd.xlane.f32.xlu1 %v476_v21 }
 0x399   :  { %v465_v23 = vpop.xlane.xlu0 %464 }
 0x39a   :  { %880 = vlog2.f32 %v465_v23 }
 0x3a4   :  { %v881_v27 = vpop.eup %880 }
 0x3a5   :  { %v467_v31 = vmul.f32 0.6931472, %v881_v27 }
 0x3a7   :  { %v468_v34 = vadd.f32 %v467_v31, %v460_v9 }
 0x409   :  { %v625_v28 = vpop.xlane.xlu1 %624 }
 0x40a   :  { %v626_v29 = vadd.f32 %v625_v28, %v615_v26 }
 0x40c   :  { %628 = vst.msk [vmem:[#allocation4] sm:$0xff] %vm313_vm5, %v626_v29 }
 0x40d   :  { %v643_v32 = vpop.xlane.xlu1 %642 }
 0x40e   :  { %v644_v33 = vadd.f32 %v643_v32, %v635_v30 }
 0x410   :  { %645 = vst.msk [vmem:[#allocation5] sm:$0xff] %vm313_vm5, %v644_v33 }
 0x411   :  { %v478_v35 = vpop.xlane.xlu1 %477 }
 0x412   :  { %v479_v36 = vsub.f32 %v468_v34, %v478_v35 }
 0x413   :  { %v650_v37 = vld [vmem:[#allocation4] sm:$0xff] }
 0x414   :  { %v481_v38 = vsel %vm313_vm5, %v479_v36, 0.0  ;;  %882 = vlog2.f32 %v650_v37 }
 0x415   :  { %482 = vadd.xlane.f32.xlu1 %v481_v38 }
 0x417   :  { %v654_v43 = vld [vmem:[#allocation5] sm:$0xff] }
 0x41e   :  { %v883_v39 = vpop.eup %882 }
 0x41f   :  { %v652_v40 = vmul.f32 0.6931472, %v883_v39 }
 0x421   :  { %v653_v42 = vadd.f32 %v652_v40, %v649_v41 }
 0x423   :  { %v655_v44 = vsub.f32 %v653_v42, %v654_v43 }
 0x425   :  { %v657_v45 = vsel %vm313_vm5, %v655_v44, 0.0 }
 0x426   :  { %658 = vadd.xlane.f32.xlu1 %v657_v45 }
 0x427   :  { %1027 = shalt.err (!%p1024_p10)
}
 0x428   :  { %s1028_s24 = scalar_lea.hbm %s1452_s16, 64 }
 0x429   :  { %p1029_p11 = scmp.ne.s32.totalorder %s1452_s16, %s1028_s24  ;;  %p1032_p12 = scmp.lt.u32.totalorder %s1028_s24, %s1452_s16 }
 0x42b   :  { %p1034_p13 = pnand %p1032_p12, %p1029_p11 }
 0x42d   :  { %1037 = shalt.err (!%p1034_p13)
}
 0x42e   :  { %688 = dma.vmem_to_hbm [thread:$0]  %s686_s4, 64, %s1452_s16, [#allocation19]  }
 0x42f   :  { %s1038_s23 = scalar_lea.vmem %s676_s14, 64  ;;  %p1043_p1 = scmp.lt.s32.totalorder %s676_s14, %s676_s14 }
 0x430   :  { %p1039_p0 = scmp.ne.s32.totalorder %s676_s14, %s1038_s23  ;;  %p1044_p2 = scmp.lt.s32.totalorder %s1038_s23, %s1038_s23 }
 0x432   :  { %p1045_p3 = por %p1044_p2, %p1043_p1 }
 0x434   :  { %p1046_p4 = pnand %p1045_p3, %p1039_p0 }
 0x436   :  { %1049 = shalt.err (!%p1046_p4)
}
 0x437   :  { %s1050_s29 = scalar_lea.hbm %s1451_s15, 64 }
 0x438   :  { %p1051_p5 = scmp.ne.s32.totalorder %s1451_s15, %s1050_s29  ;;  %p1054_p6 = scmp.lt.u32.totalorder %s1050_s29, %s1451_s15 }
 0x43a   :  { %p1056_p7 = pnand %p1054_p6, %p1051_p5 }
 0x43c   :  { %1059 = shalt.err (!%p1056_p7)
}
 0x43d   :  { %678 = dma.vmem_to_hbm [thread:$0]  %s676_s14, 64, %s1451_s15, [#allocation8]  }
 0x43e   :  { %s1132_s19 = smov [#allocation21]  }
 0x43f   :  { %s705_s9 = sshll.u32 %s1132_s19, 4  ;;  %s706_s9 = int_to_ptr.vmem [resolvable:$true] %s705_s9 }
 0x440   :  { %s1060_s15 = scalar_lea.vmem %s706_s9, 128  ;;  %p1065_p9 = scmp.lt.s32.totalorder %s706_s9, %s706_s9 }
 0x441   :  { %p1061_p8 = scmp.ne.s32.totalorder %s706_s9, %s1060_s15  ;;  %p1066_p10 = scmp.lt.s32.totalorder %s1060_s15, %s1060_s15 }
 0x443   :  { %p1067_p11 = por %p1066_p10, %p1065_p9 }
 0x445   :  { %p1068_p12 = pnand %p1067_p11, %p1061_p8 }
 0x4a2   :  { %v483_v46 = vpop.xlane.xlu1 %482 }
 0x4a3   :  { %v484_v47 = vrot.slane %v483_v46, 4 }
 0x4a5   :  { %v485_v48 = vadd.f32 %v484_v47, %v483_v46 }
 0x4a7   :  { %v486_v49 = vrot.slane %v485_v48, 2 }
 0x4a9   :  { %v487_v50 = vadd.f32 %v486_v49, %v485_v48 }
 0x4ab   :  { %v488_v51 = vrot.slane %v487_v50, 1 }
 0x4ad   :  { %v489_v52 = vadd.f32 %v488_v51, %v487_v50 }
 0x4af   :  { %833 = vpush %v489_v52 }
 0x4b3   :  { %v659_v53 = vpop.xlane.xlu1 %658 }
 0x4b4   :  { %v660_v54 = vrot.slane %v659_v53, 4 }
 0x4b6   :  { %v661_v55 = vadd.f32 %v660_v54, %v659_v53 }
 0x4b8   :  { %v662_v56 = vrot.slane %v661_v55, 2 }
 0x4ba   :  { %v663_v57 = vadd.f32 %v662_v56, %v661_v55 }
 0x4bc   :  { %v664_v58 = vrot.slane %v663_v57, 1 }
 0x4be   :  { %v665_v59 = vadd.f32 %v664_v58, %v663_v57 }
 0x4c0   :  { %835 = vpush %v665_v59 }
 0x4e0   :  { %s834_s28 = spop %833 }
 0x4e1   :  { %v491_v60 = vstv %s834_s28 }
 0x4e2   :  { %492 = vst [vmem:[#allocation21] sm:$0xff] %v491_v60 }
 0x4e3   :  { %1071 = shalt.err (!%p1068_p12)
}
 0x4e4   :  { %s1072_s4 = scalar_lea.hbm %s1454_s18, 128 }
 0x4e5   :  { %p1073_p13 = scmp.ne.s32.totalorder %s1454_s18, %s1072_s4  ;;  %p1076_p0 = scmp.lt.u32.totalorder %s1072_s4, %s1454_s18 }
 0x4e7   :  { %p1078_p1 = pnand %p1076_p0, %p1073_p13 }
 0x4e9   :  { %1081 = shalt.err (!%p1078_p1)
}
 0x4ea   :  { %708 = dma.vmem_to_hbm [thread:$0]  %s706_s9, 128, %s1454_s18, [#allocation22]  }
 0x4eb   :  { %s1133_s0 = smov [#allocation20]  }
 0x4ec   :  { %s695_s5 = sshll.u32 %s1133_s0, 4  ;;  %s696_s5 = int_to_ptr.vmem [resolvable:$true] %s695_s5 }
 0x4ed   :  { %s1082_s2 = scalar_lea.vmem %s696_s5, 128  ;;  %p1087_p3 = scmp.lt.s32.totalorder %s696_s5, %s696_s5 }
 0x4ee   :  { %p1083_p2 = scmp.ne.s32.totalorder %s696_s5, %s1082_s2  ;;  %p1088_p4 = scmp.lt.s32.totalorder %s1082_s2, %s1082_s2 }
 0x4f0   :  { %p1089_p5 = por %p1088_p4, %p1087_p3 }
 0x4f1   :  { %s836_s11 = spop %835 }
 0x4f2   :  { %v667_v61 = vstv %s836_s11  ;;  %p1090_p6 = pnand %p1089_p5, %p1083_p2 }
 0x4f3   :  { %668 = vst [vmem:[#allocation20] sm:$0xff] %v667_v61 }
 0x4f4   :  { %1093 = shalt.err (!%p1090_p6)
}
 0x4f5   :  { %s1094_s23 = scalar_lea.hbm %s1453_s17, 128 }
 0x4f6   :  { %p1095_p7 = scmp.ne.s32.totalorder %s1453_s17, %s1094_s23  ;;  %p1098_p8 = scmp.lt.u32.totalorder %s1094_s23, %s1453_s17 }
 0x4f8   :  { %p1100_p9 = pnand %p1098_p8, %p1095_p7 }
 0x4fa   :  { %1103 = shalt.err (!%p1100_p9)
}
 0x4fb   :  { %698 = dma.vmem_to_hbm [thread:$0]  %s696_s5, 128, %s1453_s17, [#allocation19]  }
 0x4fc   :  { %1112 = dma.done.wait [#allocation8], 64  }
 0x4fd   :  { %1113 = vsyncadd [#allocation8], 4294967232 }
 0x4fe   :  { %1114 = dma.done.wait [#allocation19], 192  }
 0x4ff   :  { %1115 = vsyncadd [#allocation19], 4294967104 }
 0x500   :  { %1116 = dma.done.wait [#allocation22], 128  }
 0x501   :  { %1117 = vsyncadd [#allocation22], 4294967168 }
 0x502   :  { %721 = vsyncpa [#allocation7], 1 }
 0x503   :  { %722 = vsyncpa [#allocation10], 1 }
 0x504   :  { %723 = vsyncpa [#allocation13], 1 }
 0x505   :  { %724 = vsyncpa [#allocation16], 1 }
 0x506   :  { %725 = vsyncpa [#allocation8], 1 }
 0x507   :  { %726 = vsyncpa [#allocation19], 1 }
 0x508   :  { %727 = vsyncpa [#allocation22], 1 }

</bundles_post_ra>
